<compile_context>
chip_gen: v7x
topology: tpu7x:2x2x1
jax: 0.10.0
libtpu: 0.0.40
codegen_flags: <defaults>
</compile_context>

<pallas_src>
import jax
import jax.numpy as jnp
from jax.experimental import pallas as pl
from jax.experimental.pallas import tpu as pltpu


# --------------------------------------------------------------------------- #
# Kernel
# --------------------------------------------------------------------------- #
def _mlp_kernel(x_ref, w1_ref, w2_ref, w3_ref, b_ref, out_ref):
    # x_ref  : (TM, d_in)  bf16   packed [obs | act] rows
    # w1_ref : (d_in, 128) bf16
    # w2_ref : (128, 32)   bf16
    # w3_ref : (1, 32)     f32    row form of the (32,1) output weight
    # b_ref  : (3, 128)    f32    row0 = b1, row1[:32] = b2, row2[0] = b3
    # out_ref: (TM, 1)     f32
    b1 = b_ref[0:1, :]          # (1, 128)
    b2 = b_ref[1:2, 0:32]       # (1, 32)
    b3 = b_ref[2:3, 0:1]        # (1, 1)

    # Layer 1: single fused K=d_in MXU matmul (bf16 in, f32 accumulate).
    h1 = jnp.dot(x_ref[...], w1_ref[...], preferred_element_type=jnp.float32) + b1
    h1 = jnp.maximum(h1, 0.0).astype(jnp.bfloat16)               # (TM, 128)

    # Layer 2: MXU matmul, f32 accumulate.
    h2 = jnp.dot(h1, w2_ref[...], preferred_element_type=jnp.float32) + b2
    h2 = jnp.maximum(h2, 0.0)                                     # (TM, 32) f32

    # Output layer: a (TM,32)x(32,1) MXU matmul would waste 255/256 columns ->
    # VPU multiply + XLU lane-reduce instead (both otherwise-idle slots).
    o = jnp.sum(h2 * w3_ref[...], axis=-1, keepdims=True) + b3    # (TM, 1)
    out_ref[...] = jnp.tanh(o)


# --------------------------------------------------------------------------- #
# Wrapper
# --------------------------------------------------------------------------- #
def _round_up(x, m):
    return (x + m - 1) // m * m


def reward_model_forward(obs, act, params, *, block_rows=512):
    """obs:(n_obs,) & act:(n_act,) -> (1,)   or   obs:(B,n_obs) & act:(B,n_act) -> (B,1)."""
    obs = jnp.asarray(obs, jnp.float32)
    act = jnp.asarray(act, jnp.float32)
    single = obs.ndim == 1
    if single:
        obs, act = obs[None, :], act[None, :]

    w1, w2, w3row, b_pack = params
    B = obs.shape[0]
    d_in = w1.shape[0]
    assert obs.shape[1] + act.shape[1] == d_in

    # Pack [obs | act] once on device (fuses with the bf16 cast and any row pad
    # into one XLA data-formatting op) so layer 1 is a single K=d_in matmul.
    x = jnp.concatenate([obs, act], axis=-1).astype(jnp.bfloat16)

    # Row tile: whole batch in one grid step whenever it fits (the kernel is
    # launch / per-step-overhead bound at small/medium B).  16-row alignment
    # keeps the bf16 (16,128) native sublane packing happy.  For large B, fall
    # back to TM=block_rows tiles (>=2 grid steps) so the "parallel" batch axis
    # can shard across v7x's two TensorCores without driving vreg spills.
    B16 = _round_up(B, 16)
    if B16 <= block_rows:
        TM, Bp = B16, B16
    else:
        TM = block_rows
        Bp = _round_up(B16, TM)
    if Bp != B:
        x = jnp.pad(x, ((0, Bp - B), (0, 0)))

    grid = (Bp // TM,)
    param_bytes = sum(int(p.size) * p.dtype.itemsize for p in params)

    # Grid-invariant weight specs (index_map ignores the batch index) => weights
    # are DMA'd once and stay resident in VMEM across all grid steps.
    resident = lambda shape: pl.BlockSpec(shape, lambda i: (0, 0))

    out = pl.pallas_call(
        _mlp_kernel,
        out_shape=jax.ShapeDtypeStruct((Bp, 1), jnp.float32),
        grid=grid,
        in_specs=[
            pl.BlockSpec((TM, d_in), lambda i: (i, 0)),
            resident(w1.shape),
            resident(w2.shape),
            resident(w3row.shape),
            resident(b_pack.shape),
        ],
        out_specs=pl.BlockSpec((TM, 1), lambda i: (i, 0)),
        compiler_params=pltpu.CompilerParams(
            dimension_semantics=("parallel",)),   # batch axis: 2 TCs on v7x when grid>=2
        cost_estimate=pl.CostEstimate(
            flops=2 * Bp * (d_in * 128 + 128 * 32 + 32),
            transcendentals=Bp,
            bytes_accessed=Bp * d_in * 2 + Bp * 4 + param_bytes),
    )(x, w1, w2, w3row, b_pack)

    out = out[:B]
    if single:
        return out[0]          # shape (1,), matching the PyTorch module
    return out                 # shape (B, 1)


# --------------------------------------------------------------------------- #
# Parameters (PyTorch-style Linear init), laid out for the kernel
# --------------------------------------------------------------------------- #
def init_params(key, n_observation, n_action):
    d_in = n_observation + n_action
    dims = [(d_in, 128), (128, 32), (32, 1)]
    ws, bs = [], []
    for fan_in, fan_out in dims:
        key, kw, kb = jax.random.split(key, 3)
        bound = 1.0 / jnp.sqrt(fan_in)
        ws.append(jax.random.uniform(kw, (fan_in, fan_out), jnp.float32, -bound, bound))
        bs.append(jax.random.uniform(kb, (fan_out,), jnp.float32, -bound, bound))
    w1, w2, w3 = ws
    b1, b2, b3 = bs

    # Pack all biases into one small f32 VMEM buffer (one DMA instead of three).
    b_pack = jnp.zeros((3, 128), jnp.float32)
    b_pack = b_pack.at[0, :128].set(b1)
    b_pack = b_pack.at[1, :32].set(b2)
    b_pack = b_pack.at[2, 0].set(b3[0])

    # Matmul weights in bf16 (MXU-native on v5e/v6e/v7x); the kernel keeps f32
    # accumulation.  The tiny output weight stays f32 (VPU path, accuracy-free).
    return (w1.astype(jnp.bfloat16), w2.astype(jnp.bfloat16), w3.T, b_pack)


# --------------------------------------------------------------------------- #
# Pure-JAX f32 reference (same bf16 parameter values, computed in f32)
# --------------------------------------------------------------------------- #
def _reference(obs, act, params):
    w1, w2, w3row, b_pack = params
    w1 = w1.astype(jnp.float32)
    w2 = w2.astype(jnp.float32)
    b1, b2, b3 = b_pack[0, :128], b_pack[1, :32], b_pack[2, 0]
    x = jnp.concatenate([obs, act], axis=-1)
    h1 = jax.nn.relu(x @ w1 + b1)
    h2 = jax.nn.relu(h1 @ w2 + b2)
    return jnp.tanh(jnp.sum(h2 * w3row, axis=-1, keepdims=True) + b3)


# --------------------------------------------------------------------------- #
if __name__ == "__main__":
    n_observation, n_action = 24, 8
    B = 256                                              # small batched rollout

    key = jax.random.PRNGKey(0)
    key, k_obs, k_act = jax.random.split(key, 3)
    obs = jax.random.normal(k_obs, (B, n_observation), jnp.float32)
    act = jax.random.normal(k_act, (B, n_action), jnp.float32)
    params = init_params(key, n_observation, n_action)

    fwd = jax.jit(reward_model_forward)                  # B16=256 <= 512 -> grid=(1,)
    out = jax.block_until_ready(fwd(obs, act, params))

    ref = _reference(obs, act, params)
    assert out.shape == (B, 1), out.shape
    assert jnp.allclose(out, ref, atol=2e-2), float(jnp.max(jnp.abs(out - ref)))

    # Original (single obs/act) module semantics still supported.
    out1 = jax.block_until_ready(reward_model_forward(obs[0], act[0], params))
    assert out1.shape == (1,), out1.shape
    assert jnp.allclose(out1, ref[0], atol=2e-2), (out1, ref[0])

    print("KERNEL_OK")
</pallas_src>

<mosaic_0001>
module attributes {stable_mosaic.version = 11 : i64} {
  func.func @_mlp_kernel(%arg0: i32, %arg1: memref<256x32xbf16, #tpu.memory_space<vmem>>, %arg2: memref<32x128xbf16, #tpu.memory_space<vmem>>, %arg3: memref<128x32xbf16, #tpu.memory_space<vmem>>, %arg4: memref<1x32xf32, #tpu.memory_space<vmem>>, %arg5: memref<3x128xf32, #tpu.memory_space<vmem>>, %arg6: memref<256x1xf32, #tpu.memory_space<vmem>>) attributes {dimension_semantics = [#tpu.dimension_semantics<parallel>], iteration_bounds = array<i64: 1>, scalar_prefetch = 0 : i64, scratch_operands = 0 : i64, tpu.core_type = #tpu.core_type<tc>, window_params = [{transform_indices = @transform_0, window_bounds = array<i64: 256, 32>}, {pipeline_mode = #tpu.pipeline_mode<synchronous>, transform_indices = @transform_1, window_bounds = array<i64: 32, 128>}, {pipeline_mode = #tpu.pipeline_mode<synchronous>, transform_indices = @transform_2, window_bounds = array<i64: 128, 32>}, {pipeline_mode = #tpu.pipeline_mode<synchronous>, transform_indices = @transform_3, window_bounds = array<i64: 1, 32>}, {pipeline_mode = #tpu.pipeline_mode<synchronous>, transform_indices = @transform_4, window_bounds = array<i64: 3, 128>}, {transform_indices = @transform_5, window_bounds = array<i64: 256, 1>}]} {
    %c0 = arith.constant 0 : index
    %c0_0 = arith.constant 0 : index
    %0 = vector.load %arg5[%c0, %c0_0] : memref<3x128xf32, #tpu.memory_space<vmem>>, vector<1x128xf32>
    %c1 = arith.constant 1 : index
    %c0_1 = arith.constant 0 : index
    %1 = vector.load %arg5[%c1, %c0_1] : memref<3x128xf32, #tpu.memory_space<vmem>>, vector<1x32xf32>
    %c2 = arith.constant 2 : index
    %c0_2 = arith.constant 0 : index
    %2 = vector.load %arg5[%c2, %c0_2] : memref<3x128xf32, #tpu.memory_space<vmem>>, vector<1x1xf32>
    %c0_3 = arith.constant 0 : index
    %c0_4 = arith.constant 0 : index
    %3 = vector.load %arg1[%c0_3, %c0_4] : memref<256x32xbf16, #tpu.memory_space<vmem>>, vector<256x32xbf16>
    %c0_5 = arith.constant 0 : index
    %c0_6 = arith.constant 0 : index
    %4 = vector.load %arg2[%c0_5, %c0_6] : memref<32x128xbf16, #tpu.memory_space<vmem>>, vector<32x128xbf16>
    %cst = arith.constant dense<0.000000e+00> : vector<256x128xf32>
    %5 = tpu.matmul %3, %4, %cst {dimension_numbers = #tpu.dot_dimension_numbers<[1], [0], [0], [1], [0, 0, 1, 1], [], []>} : vector<256x32xbf16>, vector<32x128xbf16>, vector<256x128xf32> -> vector<256x128xf32>
    %6 = vector.broadcast %0 : vector<1x128xf32> to vector<256x128xf32>
    %7 = arith.addf %5, %6 : vector<256x128xf32>
    %cst_7 = arith.constant 0.000000e+00 : f32
    %8 = vector.broadcast %cst_7 : f32 to vector<256x128xf32>
    %9 = arith.maximumf %7, %8 : vector<256x128xf32>
    %10 = arith.truncf %9 : vector<256x128xf32> to vector<256x128xbf16>
    %c0_8 = arith.constant 0 : index
    %c0_9 = arith.constant 0 : index
    %11 = vector.load %arg3[%c0_8, %c0_9] : memref<128x32xbf16, #tpu.memory_space<vmem>>, vector<128x32xbf16>
    %cst_10 = arith.constant dense<0.000000e+00> : vector<256x32xf32>
    %12 = tpu.matmul %10, %11, %cst_10 {dimension_numbers = #tpu.dot_dimension_numbers<[1], [0], [0], [1], [0, 0, 1, 1], [], []>} : vector<256x128xbf16>, vector<128x32xbf16>, vector<256x32xf32> -> vector<256x32xf32>
    %13 = vector.broadcast %1 : vector<1x32xf32> to vector<256x32xf32>
    %14 = arith.addf %12, %13 : vector<256x32xf32>
    %cst_11 = arith.constant 0.000000e+00 : f32
    %15 = vector.broadcast %cst_11 : f32 to vector<256x32xf32>
    %16 = arith.maximumf %14, %15 : vector<256x32xf32>
    %c0_12 = arith.constant 0 : index
    %c0_13 = arith.constant 0 : index
    %17 = vector.load %arg4[%c0_12, %c0_13] : memref<1x32xf32, #tpu.memory_space<vmem>>, vector<1x32xf32>
    %18 = vector.broadcast %17 : vector<1x32xf32> to vector<256x32xf32>
    %19 = arith.mulf %16, %18 : vector<256x32xf32>
    %cst_14 = arith.constant dense<0.000000e+00> : vector<256xf32>
    %20 = vector.multi_reduction <add>, %19, %cst_14 [1] : vector<256x32xf32> to vector<256xf32>
    %21 = vector.shape_cast %20 : vector<256xf32> to vector<256x1xf32>
    %22 = vector.broadcast %2 : vector<1x1xf32> to vector<256x1xf32>
    %23 = arith.addf %21, %22 : vector<256x1xf32>
    %24 = math.tanh %23 : vector<256x1xf32>
    %c0_15 = arith.constant 0 : index
    %c0_16 = arith.constant 0 : index
    %25 = vector.load %arg6[%c0_15, %c0_16] : memref<256x1xf32, #tpu.memory_space<vmem>>, vector<256x1xf32>
    tpu.vector_store %arg6[%c0_15, %c0_16], %24 {strides = array<i32>} : memref<256x1xf32, #tpu.memory_space<vmem>>, vector<256x1xf32>,
    return
  }
  func.func @transform_0(%arg0: i32) -> (i32, i32) {
    %c0_i32 = arith.constant 0 : i32
    %c0_i32_0 = arith.constant 0 : i32
    return %arg0, %c0_i32 : i32, i32
  }
  func.func @transform_1(%arg0: i32) -> (i32, i32) {
    %c0_i32 = arith.constant 0 : i32
    %c0_i32_0 = arith.constant 0 : i32
    %c0_i32_1 = arith.constant 0 : i32
    return %c0_i32, %c0_i32_0 : i32, i32
  }
  func.func @transform_2(%arg0: i32) -> (i32, i32) {
    %c0_i32 = arith.constant 0 : i32
    %c0_i32_0 = arith.constant 0 : i32
    %c0_i32_1 = arith.constant 0 : i32
    return %c0_i32, %c0_i32_0 : i32, i32
  }
  func.func @transform_3(%arg0: i32) -> (i32, i32) {
    %c0_i32 = arith.constant 0 : i32
    %c0_i32_0 = arith.constant 0 : i32
    %c0_i32_1 = arith.constant 0 : i32
    return %c0_i32, %c0_i32_0 : i32, i32
  }
  func.func @transform_4(%arg0: i32) -> (i32, i32) {
    %c0_i32 = arith.constant 0 : i32
    %c0_i32_0 = arith.constant 0 : i32
    %c0_i32_1 = arith.constant 0 : i32
    return %c0_i32, %c0_i32_0 : i32, i32
  }
  func.func @transform_5(%arg0: i32) -> (i32, i32) {
    %c0_i32 = arith.constant 0 : i32
    %c0_i32_0 = arith.constant 0 : i32
    return %arg0, %c0_i32 : i32, i32
  }
}

</mosaic_0001>

<bundles_post_ra>
// kernel: reward_model_forward.1
= control target key start
LH: loop header
LB: loop body
LE: loop exit
PB: predicated region body
PF: predicated region fallthrough
CT: control target
= control target key end

     0   :  { %vm156_vm0 = vcmask 261120   ;;  %vm878_vm1 = vcmask 7168   ;;  %s1625_s1 = inlined_call_operand.vmem [shape: bf16[32,128], index: 1, kind: input, shape index: {}]   ;;  %s1626_s0 = inlined_call_operand.vmem [shape: bf16[256,32], index: 0, kind: input, shape index: {}]   ;;  %s1627_s2 = inlined_call_operand.vmem [shape: bf16[128,32], index: 2, kind: input, shape index: {}]   ;;  %s1628_s4 = inlined_call_operand.vmem [shape: f32[3,128], index: 4, kind: input, shape index: {}]   ;;  %s1629_s3 = inlined_call_operand.vmem [shape: f32[1,32], index: 3, kind: input, shape index: {}]   ;;  %s1630_s5 = inlined_call_operand.vmem [shape: f32[256,1], index: 5, kind: output, shape index: {}]  }
   0x1   :  { %v1103_v0 = vld [vmem:[%s1625_s1] sm:$0xff]   ;;  %v1104_v1 = vld [vmem:[%s1625_s1 + $0x8] sm:$0xff]   ;;  %v1107_v4 = vld [vmem:[%s1626_s0 + $0x10] sm:$0xff]  }
   0x2   :  { %1003 = vmatprep.subr.bf16.mxu0 %v1103_v0  ;;  %v1105_v2 = vld [vmem:[%s1626_s0] sm:$0xff]   ;;  %v1106_v3 = vld [vmem:[%s1626_s0 + $0x8] sm:$0xff]   ;;  %v1108_v5 = vld [vmem:[%s1626_s0 + $0x18] sm:$0xff]  }
   0x3   :  { %1004 = vmatpush3.bf16.msra.mxu0 %v1103_v0  ;;  %1007 = vmatprep.mubr.msk.bf16.mxu0 %vm156_vm0, %v1105_v2  ;;  %v1109_v6 = vld [vmem:[%s1626_s0 + $0x20] sm:$0xff]   ;;  %v1122_v8 = vld [vmem:[%s1627_s2 + $0x8] sm:$0xff]   ;;  %v1123_v10 = vld [vmem:[%s1627_s2 + $0x10] sm:$0xff]  }
   0x4   :  { %1005 = vmatprep.subr.bf16.mxu0 %v1104_v1  ;;  %v1121_v7 = vld [vmem:[%s1627_s2] sm:$0xff]   ;;  %v1110_v9 = vld [vmem:[%s1626_s0 + $0x28] sm:$0xff]   ;;  %v1111_v11 = vld [vmem:[%s1626_s0 + $0x30] sm:$0xff]  }
   0x5   :  { %1087 = vmatprep.subr.bf16.mxu1 %v1121_v7  ;;  %v1124_v12 = vld [vmem:[%s1627_s2 + $0x18] sm:$0xff]   ;;  %v1125_v14 = vld [vmem:[%s1627_s2 + $0x20] sm:$0xff]   ;;  %v1126_v16 = vld [vmem:[%s1627_s2 + $0x28] sm:$0xff]  }
   0x6   :  { %1095 = vmatpush3.bf16.msra.mxu1 %v1121_v7  ;;  %v1112_v13 = vld [vmem:[%s1626_s0 + $0x38] sm:$0xff]   ;;  %v1113_v15 = vld [vmem:[%s1626_s0 + $0x40] sm:$0xff]   ;;  %v1114_v17 = vld [vmem:[%s1626_s0 + $0x48] sm:$0xff]  }
   0x7   :  { %1006 = vmatpush3.bf16.msra.mxu0 %v1104_v1  ;;  %1088 = vmatprep.subr.bf16.mxu1 %v1122_v8  ;;  %v1127_v18 = vld [vmem:[%s1627_s2 + $0x30] sm:$0xff]   ;;  %v1116_v20 = vld [vmem:[%s1626_s0 + $0x58] sm:$0xff]   ;;  %v1117_v21 = vld [vmem:[%s1626_s0 + $0x60] sm:$0xff]  }
   0x8   :  { %1039 = vmatprep.subr.bf16.mxu0 %v1121_v7  ;;  %v1115_v19 = vld [vmem:[%s1626_s0 + $0x50] sm:$0xff]   ;;  %v1118_v22 = vld [vmem:[%s1626_s0 + $0x68] sm:$0xff]   ;;  %v1120_v24 = vld [vmem:[%s1626_s0 + $0x78] sm:$0xff]  }
   0x9   :  { %v1119_v23 = vld [vmem:[%s1626_s0 + $0x70] sm:$0xff]   ;;  %v1128_v25 = vld [vmem:[%s1627_s2 + $0x38] sm:$0xff]   ;;  %v1320_v26 = vld [vmem:[%s1628_s4] ss:$0 sm:$0xff] }
   0xa   :  { %1008 = vmatmul.mubr.msk.bf16.vlgmr.msra.gmra.mrb[0].mxu0 %vm156_vm0, %v1106_v3  ;;  %1096 = vmatpush3.bf16.msra.mxu1 %v1122_v8 }
   0xb   :  { %1011 = vmatprep.mubr.msk.bf16.mxu0 %vm156_vm0, %v1107_v4  ;;  %1040 = vmatpush3.bf16.msra.mxu0 %v1121_v7 }
   0xc   :  { %1041 = vmatprep.subr.bf16.mxu0 %v1122_v8  ;;  %1089 = vmatprep.subr.bf16.mxu1 %v1123_v10 }
   0xe   :  { %1097 = vmatpush3.bf16.msra.mxu1 %v1123_v10 }
   0xf   :  { %1042 = vmatpush3.bf16.msra.mxu0 %v1122_v8  ;;  %1090 = vmatprep.subr.bf16.mxu1 %v1124_v12 }
  0x10   :  { %1043 = vmatprep.subr.bf16.mxu0 %v1123_v10 }
  0x12   :  { %1012 = vmatmul.mubr.msk.bf16.gmra.mrb[4].mxu0 %vm156_vm0, %v1108_v5  ;;  %1098 = vmatpush3.bf16.msra.mxu1 %v1124_v12 }
  0x13   :  { %1015 = vmatprep.mubr.msk.bf16.mxu0 %vm156_vm0, %v1109_v6  ;;  %1044 = vmatpush3.bf16.msra.mxu0 %v1123_v10 }
  0x14   :  { %1045 = vmatprep.subr.bf16.mxu0 %v1124_v12  ;;  %1091 = vmatprep.subr.bf16.mxu1 %v1125_v14 }
  0x16   :  { %1099 = vmatpush3.bf16.msra.mxu1 %v1125_v14 }
  0x17   :  { %1046 = vmatpush3.bf16.msra.mxu0 %v1124_v12  ;;  %1092 = vmatprep.subr.bf16.mxu1 %v1126_v16 }
  0x18   :  { %1047 = vmatprep.subr.bf16.mxu0 %v1125_v14 }
  0x1a   :  { %1016 = vmatmul.mubr.msk.bf16.gmra.mrb[8].mxu0 %vm156_vm0, %v1110_v9  ;;  %1100 = vmatpush3.bf16.msra.mxu1 %v1126_v16 }
  0x1b   :  { %1019 = vmatprep.mubr.msk.bf16.mxu0 %vm156_vm0, %v1111_v11  ;;  %1048 = vmatpush3.bf16.msra.mxu0 %v1125_v14 }
  0x1c   :  { %1049 = vmatprep.subr.bf16.mxu0 %v1126_v16  ;;  %1093 = vmatprep.subr.bf16.mxu1 %v1127_v18 }
  0x1e   :  { %1101 = vmatpush3.bf16.msra.mxu1 %v1127_v18 }
  0x1f   :  { %1050 = vmatpush3.bf16.msra.mxu0 %v1126_v16  ;;  %1094 = vmatprep.subr.bf16.mxu1 %v1128_v25 }
  0x20   :  { %1051 = vmatprep.subr.bf16.mxu0 %v1127_v18 }
  0x22   :  { %1020 = vmatmul.mubr.msk.bf16.gmra.mrb[12].mxu0 %vm156_vm0, %v1112_v13  ;;  %1102 = vmatpush3.bf16.msra.mxu1 %v1128_v25 }
  0x23   :  { %1023 = vmatprep.mubr.msk.bf16.mxu0 %vm156_vm0, %v1113_v15  ;;  %1052 = vmatpush3.bf16.msra.mxu0 %v1127_v18 }
  0x24   :  { %1053 = vmatprep.subr.bf16.mxu0 %v1128_v25 }
  0x27   :  { %1054 = vmatpush3.bf16.msra.mxu0 %v1128_v25 }
  0x2a   :  { %1024 = vmatmul.mubr.msk.bf16.gmra.mrb[16].mxu0 %vm156_vm0, %v1114_v17 }
  0x2b   :  { %1027 = vmatprep.mubr.msk.bf16.mxu0 %vm156_vm0, %v1115_v19 }
  0x32   :  { %1028 = vmatmul.mubr.msk.bf16.gmra.mrb[20].mxu0 %vm156_vm0, %v1116_v20 }
  0x33   :  { %1031 = vmatprep.mubr.msk.bf16.mxu0 %vm156_vm0, %v1117_v21 }
  0x3a   :  { %1032 = vmatmul.mubr.msk.bf16.gmra.mrb[24].mxu0 %vm156_vm0, %v1118_v22 }
  0x3b   :  { %1035 = vmatprep.mubr.msk.bf16.mxu0 %vm156_vm0, %v1119_v23 }
  0x42   :  { %1036 = vmatmul.mubr.msk.bf16.gmra.mrb[28].mxu0 %vm156_vm0, %v1120_v24 }
  0xdd   :  { %v1009_v27 = vpop.f32.mrb[0].mxu0 }
  0xde   :  { %v248_v28 = vadd.f32 %v1009_v27, %v1320_v26  ;;  %v239_v29 = vpop.f32.mrb[1].mxu0 }
  0xdf   :  { %v240_v30 = vadd.f32 %v1320_v26, %v239_v29  ;;  %v1010_v31 = vpop.f32.mrb[2].mxu0 }
  0xe0   :  { %v251_v32 = vadd.f32 %v1010_v31, %v1320_v26  ;;  %v242_v33 = vpop.f32.mrb[3].mxu0  ;;  %v368_v35 = vmax.f32 %v248_v28, 0.0 }
  0xe1   :  { %v243_v34 = vadd.f32 %v1320_v26, %v242_v33  ;;  %v366_v37 = vmax.f32 %v240_v30, 0.0 }
  0xe2   :  { %v369_v36 = vmax.f32 %v251_v32, 0.0 }
  0xe3   :  { %v367_v38 = vmax.f32 %v243_v34, 0.0 }
  0xe4   :  { %v399_v39 = vpack.c.bf16 %v369_v36, %v368_v35 }
  0xe5   :  { %v398_v40 = vpack.c.bf16 %v367_v38, %v366_v37  ;;  %v1013_v41 = vpop.f32.mrb[4].mxu0 }
  0xe6   :  { %v264_v42 = vadd.f32 %v1013_v41, %v1320_v26  ;;  %v255_v43 = vpop.f32.mrb[5].mxu0 }
  0xe7   :  { %v256_v44 = vadd.f32 %v1320_v26, %v255_v43  ;;  %v1014_v45 = vpop.f32.mrb[6].mxu0  ;;  %1055 = vmatprep.mubr.bf16.mxu0 %v398_v40 }
  0xe8   :  { %v267_v46 = vadd.f32 %v1014_v45, %v1320_v26  ;;  %v258_v47 = vpop.f32.mrb[7].mxu0  ;;  %1056 = vmatmul.mubr.bf16.vlgmr.msra.gmra.mrb[32].mxu0 %v399_v39  ;;  %v372_v49 = vmax.f32 %v264_v42, 0.0 }
  0xe9   :  { %v259_v48 = vadd.f32 %v1320_v26, %v258_v47  ;;  %v370_v51 = vmax.f32 %v256_v44, 0.0 }
  0xea   :  { %v373_v50 = vmax.f32 %v267_v46, 0.0 }
  0xeb   :  { %v371_v52 = vmax.f32 %v259_v48, 0.0 }
  0xec   :  { %v401_v53 = vpack.c.bf16 %v373_v50, %v372_v49 }
  0xed   :  { %v1017_v54 = vpop.f32.mrb[8].mxu0  ;;  %v400_v55 = vpack.c.bf16 %v371_v52, %v370_v51 }
  0xee   :  { %v280_v56 = vadd.f32 %v1017_v54, %v1320_v26  ;;  %v271_v57 = vpop.f32.mrb[9].mxu0 }
  0xef   :  { %v272_v58 = vadd.f32 %v1320_v26, %v271_v57  ;;  %v1018_v59 = vpop.f32.mrb[10].mxu0  ;;  %1059 = vmatprep.mubr.bf16.mxu1 %v400_v55 }
  0xf0   :  { %v283_v60 = vadd.f32 %v1018_v59, %v1320_v26  ;;  %v274_v61 = vpop.f32.mrb[11].mxu0  ;;  %1060 = vmatmul.mubr.bf16.vlgmr.msra.gmra.mrb[0].mxu1 %v401_v53  ;;  %v376_v63 = vmax.f32 %v280_v56, 0.0 }
  0xf1   :  { %v275_v62 = vadd.f32 %v1320_v26, %v274_v61  ;;  %v374_v1 = vmax.f32 %v272_v58, 0.0 }
  0xf2   :  { %v377_v0 = vmax.f32 %v283_v60, 0.0 }
  0xf3   :  { %v375_v2 = vmax.f32 %v275_v62, 0.0 }
  0xf4   :  { %v403_v3 = vpack.c.bf16 %v377_v0, %v376_v63 }
  0xf5   :  { %v402_v4 = vpack.c.bf16 %v375_v2, %v374_v1  ;;  %v1021_v5 = vpop.f32.mrb[12].mxu0 }
  0xf6   :  { %v296_v6 = vadd.f32 %v1021_v5, %v1320_v26  ;;  %v287_v7 = vpop.f32.mrb[13].mxu0 }
  0xf7   :  { %v288_v8 = vadd.f32 %v1320_v26, %v287_v7  ;;  %v1022_v9 = vpop.f32.mrb[14].mxu0  ;;  %1063 = vmatprep.mubr.bf16.mxu1 %v402_v4 }
  0xf8   :  { %v299_v10 = vadd.f32 %v1022_v9, %v1320_v26  ;;  %v290_v11 = vpop.f32.mrb[15].mxu0  ;;  %1064 = vmatmul.mubr.bf16.gmra.mrb[4].mxu1 %v403_v3  ;;  %v380_v13 = vmax.f32 %v296_v6, 0.0 }
  0xf9   :  { %v291_v12 = vadd.f32 %v1320_v26, %v290_v11  ;;  %v378_v15 = vmax.f32 %v288_v8, 0.0 }
  0xfa   :  { %v381_v14 = vmax.f32 %v299_v10, 0.0 }
  0xfb   :  { %v379_v16 = vmax.f32 %v291_v12, 0.0  ;;  %v1357_v12 = vld [vmem:[%s1628_s4 + $0x1] ss:$0 sm:$0xff] }
  0xfc   :  { %v405_v17 = vpack.c.bf16 %v381_v14, %v380_v13 }
  0xfd   :  { %v404_v18 = vpack.c.bf16 %v379_v16, %v378_v15  ;;  %v1025_v19 = vpop.f32.mrb[16].mxu0 }
  0xfe   :  { %v312_v20 = vadd.f32 %v1025_v19, %v1320_v26  ;;  %v303_v21 = vpop.f32.mrb[17].mxu0 }
  0xff   :  { %v304_v22 = vadd.f32 %v1320_v26, %v303_v21  ;;  %v1026_v23 = vpop.f32.mrb[18].mxu0  ;;  %1067 = vmatprep.mubr.bf16.mxu1 %v404_v18 }
 0x100   :  { %v315_v24 = vadd.f32 %v1026_v23, %v1320_v26  ;;  %v306_v25 = vpop.f32.mrb[19].mxu0  ;;  %1068 = vmatmul.mubr.bf16.gmra.mrb[8].mxu1 %v405_v17  ;;  %v384_v28 = vmax.f32 %v312_v20, 0.0  ;;  %v1364_v17 = vld [vmem:[%s1629_s3] ss:$0 sm:$0xff] }
 0x101   :  { %v307_v27 = vadd.f32 %v1320_v26, %v306_v25  ;;  %v382_v30 = vmax.f32 %v304_v22, 0.0 }
 0x102   :  { %v385_v29 = vmax.f32 %v315_v24, 0.0 }
 0x103   :  { %v383_v31 = vmax.f32 %v307_v27, 0.0 }
 0x104   :  { %v407_v32 = vpack.c.bf16 %v385_v29, %v384_v28 }
 0x105   :  { %v406_v33 = vpack.c.bf16 %v383_v31, %v382_v30  ;;  %v1029_v34 = vpop.f32.mrb[20].mxu0 }
 0x106   :  { %v328_v35 = vadd.f32 %v1029_v34, %v1320_v26  ;;  %v319_v36 = vpop.f32.mrb[21].mxu0 }
 0x107   :  { %v320_v37 = vadd.f32 %v1320_v26, %v319_v36  ;;  %v1030_v38 = vpop.f32.mrb[22].mxu0  ;;  %1071 = vmatprep.mubr.bf16.mxu1 %v406_v33 }
 0x108   :  { %v331_v39 = vadd.f32 %v1030_v38, %v1320_v26  ;;  %v322_v40 = vpop.f32.mrb[23].mxu0  ;;  %1072 = vmatmul.mubr.bf16.gmra.mrb[12].mxu1 %v407_v32  ;;  %v388_v42 = vmax.f32 %v328_v35, 0.0 }
 0x109   :  { %v323_v41 = vadd.f32 %v1320_v26, %v322_v40  ;;  %v386_v44 = vmax.f32 %v320_v37, 0.0 }
 0x10a   :  { %v389_v43 = vmax.f32 %v331_v39, 0.0 }
 0x10b   :  { %v387_v45 = vmax.f32 %v323_v41, 0.0 }
 0x10c   :  { %v409_v46 = vpack.c.bf16 %v389_v43, %v388_v42 }
 0x10d   :  { %v408_v47 = vpack.c.bf16 %v387_v45, %v386_v44  ;;  %v1033_v48 = vpop.f32.mrb[24].mxu0 }
 0x10e   :  { %v344_v49 = vadd.f32 %v1033_v48, %v1320_v26  ;;  %v335_v50 = vpop.f32.mrb[25].mxu0 }
 0x10f   :  { %v336_v51 = vadd.f32 %v1320_v26, %v335_v50  ;;  %v1034_v52 = vpop.f32.mrb[26].mxu0  ;;  %1075 = vmatprep.mubr.bf16.mxu1 %v408_v47 }
 0x110   :  { %v347_v53 = vadd.f32 %v1034_v52, %v1320_v26  ;;  %v338_v54 = vpop.f32.mrb[27].mxu0  ;;  %1076 = vmatmul.mubr.bf16.gmra.mrb[16].mxu1 %v409_v46  ;;  %v392_v56 = vmax.f32 %v344_v49, 0.0 }
 0x111   :  { %v339_v55 = vadd.f32 %v1320_v26, %v338_v54  ;;  %v390_v58 = vmax.f32 %v336_v51, 0.0 }
 0x112   :  { %v393_v57 = vmax.f32 %v347_v53, 0.0 }
 0x113   :  { %v391_v59 = vmax.f32 %v339_v55, 0.0 }
 0x114   :  { %v411_v60 = vpack.c.bf16 %v393_v57, %v392_v56 }
 0x115   :  { %v410_v61 = vpack.c.bf16 %v391_v59, %v390_v58  ;;  %v1037_v62 = vpop.f32.mrb[28].mxu0 }
 0x116   :  { %v360_v63 = vadd.f32 %v1037_v62, %v1320_v26  ;;  %v351_v0 = vpop.f32.mrb[29].mxu0 }
 0x117   :  { %v352_v1 = vadd.f32 %v1320_v26, %v351_v0  ;;  %v1038_v2 = vpop.f32.mrb[30].mxu0  ;;  %1079 = vmatprep.mubr.bf16.mxu1 %v410_v61 }
 0x118   :  { %v363_v3 = vadd.f32 %v1038_v2, %v1320_v26  ;;  %v354_v4 = vpop.f32.mrb[31].mxu0  ;;  %1080 = vmatmul.mubr.bf16.gmra.mrb[20].mxu1 %v411_v60  ;;  %v396_v6 = vmax.f32 %v360_v63, 0.0 }
 0x119   :  { %v355_v5 = vadd.f32 %v1320_v26, %v354_v4  ;;  %v394_v8 = vmax.f32 %v352_v1, 0.0 }
 0x11a   :  { %v397_v7 = vmax.f32 %v363_v3, 0.0 }
 0x11b   :  { %v395_v9 = vmax.f32 %v355_v5, 0.0 }
 0x11c   :  { %v413_v10 = vpack.c.bf16 %v397_v7, %v396_v6 }
 0x11d   :  { %v412_v11 = vpack.c.bf16 %v395_v9, %v394_v8 }
 0x11f   :  { %1083 = vmatprep.mubr.bf16.mxu1 %v412_v11 }
 0x120   :  { %1084 = vmatmul.mubr.bf16.gmra.mrb[24].mxu1 %v413_v10 }
 0x1bb   :  { %v1057_v13 = vpop.f32.mrb[32].mxu0 }
 0x1bc   :  { %v525_v14 = vadd.f32 %v1057_v13, %v1357_v12  ;;  %v516_v15 = vpop.f32.mrb[33].mxu0 }
 0x1bd   :  { %v517_v16 = vadd.f32 %v1357_v12, %v516_v15  ;;  %v1058_v26 = vpop.f32.mrb[34].mxu0 }
 0x1be   :  { %v645_v18 = vmax.f32 %v525_v14, 0.0  ;;  %v528_v19 = vadd.f32 %v1058_v26, %v1357_v12  ;;  %v519_v20 = vpop.f32.mrb[35].mxu0 }
 0x1bf   :  { %v643_v21 = vmax.f32 %v517_v16, 0.0  ;;  %v520_v22 = vadd.f32 %v1357_v12, %v519_v20 }
 0x1c0   :  { %v646_v23 = vmax.f32 %v528_v19, 0.0  ;;  %v684_v24 = vmul.f32 %v1364_v17, %v645_v18 }
 0x1c1   :  { %v644_v25 = vmax.f32 %v520_v22, 0.0  ;;  %v682_v27 = vmul.f32 %v1364_v17, %v643_v21 }
 0x1c2   :  { %v720_v28 = vsel %vm156_vm0, %v684_v24, 0.0  ;;  %v685_v29 = vmul.f32 %v1364_v17, %v646_v23 }
 0x1c3   :  { %v1061_v30 = vpop.f32.mrb[0].mxu1  ;;  %721 = vadd.xlane.f32.xlu1 %v720_v28  ;;  %v714_v31 = vsel %vm156_vm0, %v682_v27, 0.0  ;;  %v683_v32 = vmul.f32 %v1364_v17, %v644_v25 }
 0x1c4   :  { %v541_v33 = vadd.f32 %v1061_v30, %v1357_v12  ;;  %v532_v34 = vpop.f32.mrb[1].mxu1  ;;  %715 = vadd.xlane.f32.xlu0 %v714_v31  ;;  %v723_v40 = vsel %vm156_vm0, %v685_v29, 0.0 }
 0x1c5   :  { %v533_v35 = vadd.f32 %v1357_v12, %v532_v34  ;;  %v1062_v36 = vpop.f32.mrb[2].mxu1  ;;  %v717_v43 = vsel %vm156_vm0, %v683_v32, 0.0 }
 0x1c6   :  { %v649_v37 = vmax.f32 %v541_v33, 0.0  ;;  %v544_v38 = vadd.f32 %v1062_v36, %v1357_v12  ;;  %v535_v39 = vpop.f32.mrb[3].mxu1 }
 0x1c7   :  { %v647_v41 = vmax.f32 %v533_v35, 0.0  ;;  %v536_v42 = vadd.f32 %v1357_v12, %v535_v39  ;;  %724 = vadd.xlane.f32.xlu1 %v723_v40 }
 0x1c8   :  { %v650_v44 = vmax.f32 %v544_v38, 0.0  ;;  %718 = vadd.xlane.f32.xlu0 %v717_v43  ;;  %v688_v45 = vmul.f32 %v1364_v17, %v649_v37 }
 0x1c9   :  { %v648_v46 = vmax.f32 %v536_v42, 0.0  ;;  %v686_v50 = vmul.f32 %v1364_v17, %v647_v41 }
 0x1ca   :  { %v732_v47 = vsel %vm156_vm0, %v688_v45, 0.0  ;;  %v689_v48 = vmul.f32 %v1364_v17, %v650_v44 }
 0x1cb   :  { %v1065_v49 = vpop.f32.mrb[4].mxu1  ;;  %v687_v54 = vmul.f32 %v1364_v17, %v648_v46  ;;  %v726_v62 = vsel %vm156_vm0, %v686_v50, 0.0 }
 0x1cc   :  { %v557_v51 = vadd.f32 %v1065_v49, %v1357_v12  ;;  %v548_v52 = vpop.f32.mrb[5].mxu1  ;;  %733 = vadd.xlane.f32.xlu0 %v732_v47  ;;  %v735_v53 = vsel %vm156_vm0, %v689_v48, 0.0 }
 0x1cd   :  { %v549_v55 = vadd.f32 %v1357_v12, %v548_v52  ;;  %v1066_v56 = vpop.f32.mrb[6].mxu1  ;;  %736 = vadd.xlane.f32.xlu1 %v735_v53  ;;  %v729_v0 = vsel %vm156_vm0, %v687_v54, 0.0 }
 0x1ce   :  { %v653_v57 = vmax.f32 %v557_v51, 0.0  ;;  %v560_v58 = vadd.f32 %v1066_v56, %v1357_v12  ;;  %v551_v59 = vpop.f32.mrb[7].mxu1 }
 0x1cf   :  { %v651_v60 = vmax.f32 %v549_v55, 0.0  ;;  %v552_v61 = vadd.f32 %v1357_v12, %v551_v59 }
 0x1d0   :  { %v654_v63 = vmax.f32 %v560_v58, 0.0  ;;  %727 = vadd.xlane.f32.xlu0 %v726_v62  ;;  %v692_v1 = vmul.f32 %v1364_v17, %v653_v57 }
 0x1d1   :  { %v652_v2 = vmax.f32 %v552_v61, 0.0  ;;  %730 = vadd.xlane.f32.xlu1 %v729_v0  ;;  %v690_v6 = vmul.f32 %v1364_v17, %v651_v60 }
 0x1d2   :  { %v744_v3 = vsel %vm156_vm0, %v692_v1, 0.0  ;;  %v693_v4 = vmul.f32 %v1364_v17, %v654_v63 }
 0x1d3   :  { %v1069_v5 = vpop.f32.mrb[8].mxu1  ;;  %v691_v10 = vmul.f32 %v1364_v17, %v652_v2  ;;  %v738_v19 = vsel %vm156_vm0, %v690_v6, 0.0 }
 0x1d4   :  { %v573_v7 = vadd.f32 %v1069_v5, %v1357_v12  ;;  %v564_v8 = vpop.f32.mrb[9].mxu1  ;;  %745 = vadd.xlane.f32.xlu0 %v744_v3  ;;  %v747_v9 = vsel %vm156_vm0, %v693_v4, 0.0 }
 0x1d5   :  { %v565_v11 = vadd.f32 %v1357_v12, %v564_v8  ;;  %v1070_v13 = vpop.f32.mrb[10].mxu1  ;;  %748 = vadd.xlane.f32.xlu1 %v747_v9  ;;  %v741_v21 = vsel %vm156_vm0, %v691_v10, 0.0 }
 0x1d6   :  { %v657_v14 = vmax.f32 %v573_v7, 0.0  ;;  %v576_v15 = vadd.f32 %v1070_v13, %v1357_v12  ;;  %v567_v16 = vpop.f32.mrb[11].mxu1 }
 0x1d7   :  { %v655_v26 = vmax.f32 %v565_v11, 0.0  ;;  %v568_v18 = vadd.f32 %v1357_v12, %v567_v16 }
 0x1d8   :  { %v658_v20 = vmax.f32 %v576_v15, 0.0  ;;  %739 = vadd.xlane.f32.xlu0 %v738_v19  ;;  %v696_v22 = vmul.f32 %v1364_v17, %v657_v14 }
 0x1d9   :  { %v656_v23 = vmax.f32 %v568_v18, 0.0  ;;  %742 = vadd.xlane.f32.xlu1 %v741_v21  ;;  %v694_v28 = vmul.f32 %v1364_v17, %v655_v26 }
 0x1da   :  { %v756_v24 = vsel %vm156_vm0, %v696_v22, 0.0  ;;  %v697_v25 = vmul.f32 %v1364_v17, %v658_v20 }
 0x1db   :  { %v1073_v27 = vpop.f32.mrb[12].mxu1  ;;  %v695_v32 = vmul.f32 %v1364_v17, %v656_v23  ;;  %v750_v40 = vsel %vm156_vm0, %v694_v28, 0.0 }
 0x1dc   :  { %v589_v29 = vadd.f32 %v1073_v27, %v1357_v12  ;;  %v580_v30 = vpop.f32.mrb[13].mxu1  ;;  %757 = vadd.xlane.f32.xlu0 %v756_v24  ;;  %v759_v31 = vsel %vm156_vm0, %v697_v25, 0.0 }
 0x1dd   :  { %v581_v33 = vadd.f32 %v1357_v12, %v580_v30  ;;  %v1074_v34 = vpop.f32.mrb[14].mxu1  ;;  %760 = vadd.xlane.f32.xlu1 %v759_v31  ;;  %v753_v42 = vsel %vm156_vm0, %v695_v32, 0.0 }
 0x1de   :  { %v661_v35 = vmax.f32 %v589_v29, 0.0  ;;  %v592_v36 = vadd.f32 %v1074_v34, %v1357_v12  ;;  %v583_v37 = vpop.f32.mrb[15].mxu1 }
 0x1df   :  { %v659_v38 = vmax.f32 %v581_v33, 0.0  ;;  %v584_v39 = vadd.f32 %v1357_v12, %v583_v37 }
 0x1e0   :  { %v662_v41 = vmax.f32 %v592_v36, 0.0  ;;  %751 = vadd.xlane.f32.xlu0 %v750_v40  ;;  %v700_v43 = vmul.f32 %v1364_v17, %v661_v35 }
 0x1e1   :  { %v660_v44 = vmax.f32 %v584_v39, 0.0  ;;  %754 = vadd.xlane.f32.xlu1 %v753_v42  ;;  %v698_v48 = vmul.f32 %v1364_v17, %v659_v38 }
 0x1e2   :  { %v768_v45 = vsel %vm156_vm0, %v700_v43, 0.0  ;;  %v701_v46 = vmul.f32 %v1364_v17, %v662_v41 }
 0x1e3   :  { %v1077_v47 = vpop.f32.mrb[16].mxu1  ;;  %v699_v52 = vmul.f32 %v1364_v17, %v660_v44  ;;  %v762_v60 = vsel %vm156_vm0, %v698_v48, 0.0 }
 0x1e4   :  { %v605_v49 = vadd.f32 %v1077_v47, %v1357_v12  ;;  %v596_v50 = vpop.f32.mrb[17].mxu1  ;;  %769 = vadd.xlane.f32.xlu0 %v768_v45  ;;  %v771_v51 = vsel %vm156_vm0, %v701_v46, 0.0 }
 0x1e5   :  { %v597_v53 = vadd.f32 %v1357_v12, %v596_v50  ;;  %v1078_v54 = vpop.f32.mrb[18].mxu1  ;;  %772 = vadd.xlane.f32.xlu1 %v771_v51  ;;  %v765_v62 = vsel %vm156_vm0, %v699_v52, 0.0 }
 0x1e6   :  { %v665_v55 = vmax.f32 %v605_v49, 0.0  ;;  %v608_v56 = vadd.f32 %v1078_v54, %v1357_v12  ;;  %v599_v57 = vpop.f32.mrb[19].mxu1  ;;  %v1463_v49 = vld [vmem:[%s1628_s4 + $0x2] ss:$0 sm:$0xff] }
 0x1e7   :  { %v663_v58 = vmax.f32 %v597_v53, 0.0  ;;  %v600_v59 = vadd.f32 %v1357_v12, %v599_v57 }
 0x1e8   :  { %v666_v61 = vmax.f32 %v608_v56, 0.0  ;;  %763 = vadd.xlane.f32.xlu0 %v762_v60  ;;  %v704_v63 = vmul.f32 %v1364_v17, %v665_v55 }
 0x1e9   :  { %v664_v0 = vmax.f32 %v600_v59, 0.0  ;;  %766 = vadd.xlane.f32.xlu1 %v765_v62  ;;  %v702_v4 = vmul.f32 %v1364_v17, %v663_v58 }
 0x1ea   :  { %v780_v1 = vsel %vm156_vm0, %v704_v63, 0.0  ;;  %v705_v2 = vmul.f32 %v1364_v17, %v666_v61 }
 0x1eb   :  { %v1081_v3 = vpop.f32.mrb[20].mxu1  ;;  %v703_v8 = vmul.f32 %v1364_v17, %v664_v0  ;;  %v774_v26 = vsel %vm156_vm0, %v702_v4, 0.0 }
 0x1ec   :  { %v621_v5 = vadd.f32 %v1081_v3, %v1357_v12  ;;  %v612_v6 = vpop.f32.mrb[21].mxu1  ;;  %781 = vadd.xlane.f32.xlu0 %v780_v1  ;;  %v783_v7 = vsel %vm156_vm0, %v705_v2, 0.0 }
 0x1ed   :  { %v613_v9 = vadd.f32 %v1357_v12, %v612_v6  ;;  %v1082_v10 = vpop.f32.mrb[22].mxu1  ;;  %784 = vadd.xlane.f32.xlu1 %v783_v7  ;;  %v777_v19 = vsel %vm156_vm0, %v703_v8, 0.0 }
 0x1ee   :  { %v669_v11 = vmax.f32 %v621_v5, 0.0  ;;  %v624_v13 = vadd.f32 %v1082_v10, %v1357_v12  ;;  %v615_v14 = vpop.f32.mrb[23].mxu1 }
 0x1ef   :  { %v667_v15 = vmax.f32 %v613_v9, 0.0  ;;  %v616_v16 = vadd.f32 %v1357_v12, %v615_v14 }
 0x1f0   :  { %v670_v18 = vmax.f32 %v624_v13, 0.0  ;;  %775 = vadd.xlane.f32.xlu0 %v774_v26  ;;  %v708_v20 = vmul.f32 %v1364_v17, %v669_v11 }
 0x1f1   :  { %v668_v21 = vmax.f32 %v616_v16, 0.0  ;;  %778 = vadd.xlane.f32.xlu1 %v777_v19  ;;  %v706_v25 = vmul.f32 %v1364_v17, %v667_v15 }
 0x1f2   :  { %v792_v22 = vsel %vm156_vm0, %v708_v20, 0.0  ;;  %v709_v23 = vmul.f32 %v1364_v17, %v670_v18 }
 0x1f3   :  { %v1085_v24 = vpop.f32.mrb[24].mxu1  ;;  %v707_v30 = vmul.f32 %v1364_v17, %v668_v21  ;;  %v786_v38 = vsel %vm156_vm0, %v706_v25, 0.0 }
 0x1f4   :  { %v637_v27 = vadd.f32 %v1085_v24, %v1357_v12  ;;  %v628_v28 = vpop.f32.mrb[25].mxu1  ;;  %793 = vadd.xlane.f32.xlu0 %v792_v22  ;;  %v795_v29 = vsel %vm156_vm0, %v709_v23, 0.0 }
 0x1f5   :  { %v629_v31 = vadd.f32 %v1357_v12, %v628_v28  ;;  %v1086_v32 = vpop.f32.mrb[26].mxu1  ;;  %796 = vadd.xlane.f32.xlu1 %v795_v29  ;;  %v789_v39 = vsel %vm156_vm0, %v707_v30, 0.0 }
 0x1f6   :  { %v640_v33 = vadd.f32 %v1086_v32, %v1357_v12  ;;  %v631_v34 = vpop.f32.mrb[27].mxu1  ;;  %v673_v35 = vmax.f32 %v637_v27, 0.0 }
 0x1f7   :  { %v671_v36 = vmax.f32 %v629_v31, 0.0  ;;  %v632_v37 = vadd.f32 %v1357_v12, %v631_v34 }
 0x1f8   :  { %787 = vadd.xlane.f32.xlu0 %v786_v38  ;;  %v674_v40 = vmax.f32 %v640_v33, 0.0  ;;  %v712_v45 = vmul.f32 %v1364_v17, %v673_v35 }
 0x1f9   :  { %v672_v41 = vmax.f32 %v632_v37, 0.0  ;;  %790 = vadd.xlane.f32.xlu1 %v789_v39  ;;  %v710_v42 = vmul.f32 %v1364_v17, %v671_v36 }
 0x1fa   :  { %v713_v12 = vmul.f32 %v1364_v17, %v674_v40  ;;  %v804_v47 = vsel %vm156_vm0, %v712_v45, 0.0 }
 0x1fb   :  { %v798_v43 = vsel %vm156_vm0, %v710_v42, 0.0  ;;  %v711_v44 = vmul.f32 %v1364_v17, %v672_v41 }
 0x1fc   :  { %799 = vadd.xlane.f32.xlu0 %v798_v43  ;;  %v807_v48 = vsel %vm156_vm0, %v713_v12, 0.0 }
 0x1fd   :  { %v801_v46 = vsel %vm156_vm0, %v711_v44, 0.0 }
 0x1fe   :  { %802 = vadd.xlane.f32.xlu1 %v801_v46 }
 0x200   :  { %805 = vadd.xlane.f32.xlu0 %v804_v47 }
 0x202   :  { %808 = vadd.xlane.f32.xlu1 %v807_v48 }
 0x250   :  { %v722_v50 = vpop.xlane.xlu1 %721 }
 0x251   :  { %v816_v51 = vadd.f32 %v1463_v49, %v722_v50  ;;  %v716_v52 = vpop.xlane.xlu0 %715 }
 0x252   :  { %v814_v53 = vadd.f32 %v1463_v49, %v716_v52 }
 0x253   :  { %1129 = vtanh.f32 %v816_v51 }
 0x254   :  { %1131 = vtanh.f32 %v814_v53  ;;  %v725_v17 = vpop.xlane.xlu1 %724 }
 0x255   :  { %v817_v54 = vadd.f32 %v1463_v49, %v725_v17  ;;  %v719_v55 = vpop.xlane.xlu0 %718 }
 0x256   :  { %v815_v56 = vadd.f32 %v1463_v49, %v719_v55 }
 0x257   :  { %1133 = vtanh.f32 %v817_v54 }
 0x258   :  { %1135 = vtanh.f32 %v815_v56 }
 0x259   :  { %v734_v57 = vpop.xlane.xlu0 %733 }
 0x25a   :  { %v820_v58 = vadd.f32 %v1463_v49, %v734_v57  ;;  %v737_v59 = vpop.xlane.xlu1 %736 }
 0x25b   :  { %v821_v60 = vadd.f32 %v1463_v49, %v737_v59 }
 0x25c   :  { %1137 = vtanh.f32 %v820_v58 }
 0x25d   :  { %v1130_v61 = vpop.eup %1129  ;;  %1139 = vtanh.f32 %v821_v60  ;;  %v728_v62 = vpop.xlane.xlu0 %727 }
 0x25e   :  { %v1132_v63 = vpop.eup %1131  ;;  %881 = vst.msk [vmem:[%s1630_s5 + $0x10] sm:$0xff] %vm878_vm1, %v1130_v61  ;;  %v818_v0 = vadd.f32 %v1463_v49, %v728_v62  ;;  %v731_v1 = vpop.xlane.xlu1 %730 }
 0x25f   :  { %879 = vst.msk [vmem:[%s1630_s5] sm:$0xff] %vm878_vm1, %v1132_v63  ;;  %v819_v2 = vadd.f32 %v1463_v49, %v731_v1 }
 0x260   :  { %1141 = vtanh.f32 %v818_v0 }
 0x261   :  { %v1134_v3 = vpop.eup %1133  ;;  %1143 = vtanh.f32 %v819_v2  ;;  %v746_v4 = vpop.xlane.xlu0 %745 }
 0x262   :  { %v1136_v5 = vpop.eup %1135  ;;  %882 = vst.msk [vmem:[%s1630_s5 + $0x18] sm:$0xff] %vm878_vm1, %v1134_v3  ;;  %v824_v6 = vadd.f32 %v1463_v49, %v746_v4  ;;  %v749_v7 = vpop.xlane.xlu1 %748 }
 0x263   :  { %880 = vst.msk [vmem:[%s1630_s5 + $0x8] sm:$0xff] %vm878_vm1, %v1136_v5  ;;  %v825_v8 = vadd.f32 %v1463_v49, %v749_v7 }
 0x264   :  { %1145 = vtanh.f32 %v824_v6 }
 0x265   :  { %1147 = vtanh.f32 %v825_v8  ;;  %v740_v9 = vpop.xlane.xlu0 %739 }
 0x266   :  { %v1138_v10 = vpop.eup %1137  ;;  %v822_v11 = vadd.f32 %v1463_v49, %v740_v9  ;;  %v743_v13 = vpop.xlane.xlu1 %742 }
 0x267   :  { %v1140_v14 = vpop.eup %1139  ;;  %885 = vst.msk [vmem:[%s1630_s5 + $0x30] sm:$0xff] %vm878_vm1, %v1138_v10  ;;  %v823_v15 = vadd.f32 %v1463_v49, %v743_v13 }
 0x268   :  { %886 = vst.msk [vmem:[%s1630_s5 + $0x38] sm:$0xff] %vm878_vm1, %v1140_v14  ;;  %1149 = vtanh.f32 %v822_v11 }
 0x269   :  { %1151 = vtanh.f32 %v823_v15  ;;  %v758_v16 = vpop.xlane.xlu0 %757 }
 0x26a   :  { %v1142_v26 = vpop.eup %1141  ;;  %v828_v18 = vadd.f32 %v1463_v49, %v758_v16  ;;  %v761_v19 = vpop.xlane.xlu1 %760 }
 0x26b   :  { %v1144_v20 = vpop.eup %1143  ;;  %883 = vst.msk [vmem:[%s1630_s5 + $0x20] sm:$0xff] %vm878_vm1, %v1142_v26  ;;  %v829_v21 = vadd.f32 %v1463_v49, %v761_v19 }
 0x26c   :  { %884 = vst.msk [vmem:[%s1630_s5 + $0x28] sm:$0xff] %vm878_vm1, %v1144_v20  ;;  %1153 = vtanh.f32 %v828_v18 }
 0x26d   :  { %1155 = vtanh.f32 %v829_v21  ;;  %v752_v22 = vpop.xlane.xlu0 %751 }
 0x26e   :  { %v1146_v23 = vpop.eup %1145  ;;  %v826_v24 = vadd.f32 %v1463_v49, %v752_v22  ;;  %v755_v25 = vpop.xlane.xlu1 %754 }
 0x26f   :  { %v1148_v27 = vpop.eup %1147  ;;  %889 = vst.msk [vmem:[%s1630_s5 + $0x50] sm:$0xff] %vm878_vm1, %v1146_v23  ;;  %v827_v28 = vadd.f32 %v1463_v49, %v755_v25 }
 0x270   :  { %890 = vst.msk [vmem:[%s1630_s5 + $0x58] sm:$0xff] %vm878_vm1, %v1148_v27  ;;  %1157 = vtanh.f32 %v826_v24 }
 0x271   :  { %1159 = vtanh.f32 %v827_v28  ;;  %v770_v29 = vpop.xlane.xlu0 %769 }
 0x272   :  { %v1150_v30 = vpop.eup %1149  ;;  %v832_v31 = vadd.f32 %v1463_v49, %v770_v29  ;;  %v773_v32 = vpop.xlane.xlu1 %772 }
 0x273   :  { %v1152_v33 = vpop.eup %1151  ;;  %887 = vst.msk [vmem:[%s1630_s5 + $0x40] sm:$0xff] %vm878_vm1, %v1150_v30  ;;  %v833_v34 = vadd.f32 %v1463_v49, %v773_v32 }
 0x274   :  { %888 = vst.msk [vmem:[%s1630_s5 + $0x48] sm:$0xff] %vm878_vm1, %v1152_v33  ;;  %1161 = vtanh.f32 %v832_v31 }
 0x275   :  { %1163 = vtanh.f32 %v833_v34  ;;  %v764_v35 = vpop.xlane.xlu0 %763 }
 0x276   :  { %v1154_v36 = vpop.eup %1153  ;;  %v830_v37 = vadd.f32 %v1463_v49, %v764_v35  ;;  %v767_v38 = vpop.xlane.xlu1 %766 }
 0x277   :  { %v1156_v39 = vpop.eup %1155  ;;  %893 = vst.msk [vmem:[%s1630_s5 + $0x70] sm:$0xff] %vm878_vm1, %v1154_v36  ;;  %v831_v40 = vadd.f32 %v1463_v49, %v767_v38 }
 0x278   :  { %894 = vst.msk [vmem:[%s1630_s5 + $0x78] sm:$0xff] %vm878_vm1, %v1156_v39  ;;  %1165 = vtanh.f32 %v830_v37 }
 0x279   :  { %1167 = vtanh.f32 %v831_v40  ;;  %v782_v41 = vpop.xlane.xlu0 %781 }
 0x27a   :  { %v1158_v42 = vpop.eup %1157  ;;  %v836_v43 = vadd.f32 %v1463_v49, %v782_v41  ;;  %v785_v44 = vpop.xlane.xlu1 %784 }
 0x27b   :  { %v1160_v45 = vpop.eup %1159  ;;  %891 = vst.msk [vmem:[%s1630_s5 + $0x60] sm:$0xff] %vm878_vm1, %v1158_v42  ;;  %v837_v46 = vadd.f32 %v1463_v49, %v785_v44 }
 0x27c   :  { %892 = vst.msk [vmem:[%s1630_s5 + $0x68] sm:$0xff] %vm878_vm1, %v1160_v45  ;;  %1169 = vtanh.f32 %v836_v43 }
 0x27d   :  { %1171 = vtanh.f32 %v837_v46  ;;  %v776_v12 = vpop.xlane.xlu0 %775 }
 0x27e   :  { %v1162_v47 = vpop.eup %1161  ;;  %v834_v48 = vadd.f32 %v1463_v49, %v776_v12  ;;  %v779_v50 = vpop.xlane.xlu1 %778 }
 0x27f   :  { %v1164_v51 = vpop.eup %1163  ;;  %897 = vst.msk [vmem:[%s1630_s5 + $0x90] sm:$0xff] %vm878_vm1, %v1162_v47  ;;  %v835_v52 = vadd.f32 %v1463_v49, %v779_v50 }
 0x280   :  { %898 = vst.msk [vmem:[%s1630_s5 + $0x98] sm:$0xff] %vm878_vm1, %v1164_v51  ;;  %1173 = vtanh.f32 %v834_v48 }
 0x281   :  { %1175 = vtanh.f32 %v835_v52  ;;  %v794_v53 = vpop.xlane.xlu0 %793 }
 0x282   :  { %v1166_v17 = vpop.eup %1165  ;;  %v840_v54 = vadd.f32 %v1463_v49, %v794_v53  ;;  %v797_v55 = vpop.xlane.xlu1 %796 }
 0x283   :  { %v1168_v56 = vpop.eup %1167  ;;  %895 = vst.msk [vmem:[%s1630_s5 + $0x80] sm:$0xff] %vm878_vm1, %v1166_v17  ;;  %v841_v57 = vadd.f32 %v1463_v49, %v797_v55 }
 0x284   :  { %896 = vst.msk [vmem:[%s1630_s5 + $0x88] sm:$0xff] %vm878_vm1, %v1168_v56  ;;  %1177 = vtanh.f32 %v840_v54 }
 0x285   :  { %1179 = vtanh.f32 %v841_v57  ;;  %v788_v58 = vpop.xlane.xlu0 %787 }
 0x286   :  { %v1170_v59 = vpop.eup %1169  ;;  %v838_v60 = vadd.f32 %v1463_v49, %v788_v58  ;;  %v791_v61 = vpop.xlane.xlu1 %790 }
 0x287   :  { %v1172_v62 = vpop.eup %1171  ;;  %901 = vst.msk [vmem:[%s1630_s5 + $0xb0] sm:$0xff] %vm878_vm1, %v1170_v59  ;;  %v839_v63 = vadd.f32 %v1463_v49, %v791_v61 }
 0x288   :  { %902 = vst.msk [vmem:[%s1630_s5 + $0xb8] sm:$0xff] %vm878_vm1, %v1172_v62  ;;  %1181 = vtanh.f32 %v838_v60 }
 0x289   :  { %1183 = vtanh.f32 %v839_v63  ;;  %v800_v0 = vpop.xlane.xlu0 %799 }
 0x28a   :  { %v1174_v1 = vpop.eup %1173  ;;  %v842_v2 = vadd.f32 %v1463_v49, %v800_v0 }
 0x28b   :  { %v1176_v3 = vpop.eup %1175  ;;  %899 = vst.msk [vmem:[%s1630_s5 + $0xa0] sm:$0xff] %vm878_vm1, %v1174_v1  ;;  %v803_v4 = vpop.xlane.xlu1 %802 }
 0x28c   :  { %900 = vst.msk [vmem:[%s1630_s5 + $0xa8] sm:$0xff] %vm878_vm1, %v1176_v3  ;;  %1185 = vtanh.f32 %v842_v2  ;;  %v843_v5 = vadd.f32 %v1463_v49, %v803_v4 }
 0x28d   :  { %v806_v6 = vpop.xlane.xlu0 %805 }
 0x28e   :  { %v1178_v7 = vpop.eup %1177  ;;  %1187 = vtanh.f32 %v843_v5  ;;  %v844_v8 = vadd.f32 %v1463_v49, %v806_v6 }
 0x28f   :  { %v1180_v9 = vpop.eup %1179  ;;  %905 = vst.msk [vmem:[%s1630_s5 + $0xd0] sm:$0xff] %vm878_vm1, %v1178_v7  ;;  %v809_v10 = vpop.xlane.xlu1 %808 }
 0x290   :  { %906 = vst.msk [vmem:[%s1630_s5 + $0xd8] sm:$0xff] %vm878_vm1, %v1180_v9  ;;  %1189 = vtanh.f32 %v844_v8  ;;  %v845_v11 = vadd.f32 %v1463_v49, %v809_v10 }
 0x292   :  { %v1182_v13 = vpop.eup %1181  ;;  %1191 = vtanh.f32 %v845_v11 }
 0x293   :  { %v1184_v14 = vpop.eup %1183  ;;  %903 = vst.msk [vmem:[%s1630_s5 + $0xc0] sm:$0xff] %vm878_vm1, %v1182_v13 }
 0x294   :  { %904 = vst.msk [vmem:[%s1630_s5 + $0xc8] sm:$0xff] %vm878_vm1, %v1184_v14 }
 0x296   :  { %v1186_v15 = vpop.eup %1185 }
 0x297   :  { %907 = vst.msk [vmem:[%s1630_s5 + $0xe0] sm:$0xff] %vm878_vm1, %v1186_v15 }
 0x298   :  { %v1188_v49 = vpop.eup %1187 }
 0x299   :  { %908 = vst.msk [vmem:[%s1630_s5 + $0xe8] sm:$0xff] %vm878_vm1, %v1188_v49 }
 0x29a   :  { %v1190_v16 = vpop.eup %1189 }
 0x29b   :  { %909 = vst.msk [vmem:[%s1630_s5 + $0xf0] sm:$0xff] %vm878_vm1, %v1190_v16 }
 0x29c   :  { %v1192_v26 = vpop.eup %1191 }
 0x29d   :  { %910 = vst.msk [vmem:[%s1630_s5 + $0xf8] sm:$0xff] %vm878_vm1, %v1192_v26 }

</bundles_post_ra>
